<compile_context>
chip_gen: v6e
topology: v6e:2x2x1
jax: 0.10.0
libtpu: 0.0.40
codegen_flags: <defaults>
</compile_context>

<pallas_src>
import jax
import jax.numpy as jnp
from jax import lax
from jax.experimental import pallas as pl
from jax.experimental.pallas import tpu as pltpu


# ----------------------------------------------------------------------------
# Fused kernel: analysis -> complexnorm -> stacked mask nets -> phasemix ->
#               synthesis, for ALL targets of one row tile per grid step.
# grid = (row_tiles,)
# ----------------------------------------------------------------------------
def _separator_kernel(frames_ref, wa_ref, ws_ref, wt_ref, bt_ref, out_ref,
                      u_sc, yc_sc):
    F = wt_ref.shape[0]
    n_targets = out_ref.shape[0]

    # --- nsgt (analysis): fused real|imag filterbank, f32 MXU accumulation ---
    x = jnp.dot(frames_ref[...], wa_ref[...],
                preferred_element_type=jnp.float32)             # (tm, 2F) = [re|im]
    xre = x[:, :F]
    xim = x[:, F:]

    # --- ComplexNorm (power=1) + unit phase: one transcendental per element ---
    power = xre * xre + xim * xim
    inv = lax.rsqrt(power + 1e-12)                              # EUP
    xmag = power * inv                                          # |X| = power*rsqrt(power)
    u_sc[:, :F] = (xre * inv).astype(u_sc.dtype)                # X/|X| cached in bf16
    u_sc[:, F:] = (xim * inv).astype(u_sc.dtype)

    # --- all target mask nets in ONE stacked matmul: (tm,F) @ (F, nT*F) -------
    # (linear-ReLU stand-in for the GRU target models)
    ymag_all = jnp.dot(xmag.astype(wt_ref.dtype), wt_ref[...],
                       preferred_element_type=jnp.float32) + bt_ref[...]
    ymag_all = jnp.maximum(ymag_all, 0.0).astype(jnp.bfloat16)  # ReLU, (tm, nT*F)

    u = u_sc[...]
    for t in range(n_targets):                                  # static unroll (nT small)
        scale = ymag_all[:, t * F:(t + 1) * F]                  # (tm, F)
        # --- phasemix_sep: Y = Ymag * X / |X| (write halves, no concatenate) --
        yc_sc[:, :F] = u[:, :F] * scale
        yc_sc[:, F:] = u[:, F:] * scale
        # --- insgt (synthesis): fused (tm, 2F) @ (2F, L) matmul ---------------
        y = jnp.dot(yc_sc[...], ws_ref[...],
                    preferred_element_type=jnp.float32)          # (tm, L)
        out_ref[t] = y.astype(out_ref.dtype)


# ----------------------------------------------------------------------------
# Wrapper: frame the whole signal once, run a single pallas_call, crop/permute.
# ----------------------------------------------------------------------------
def separator_forward(audio, wre, wim, wt, bt, ire, iim, *, frame_len,
                      row_tile=1024):
    """audio: (nb_samples, nb_channels, nb_timesteps) ->
       (nb_samples, nb_targets, nb_channels, nb_timesteps)"""
    B, C, T = audio.shape
    n_targets, Fq, _ = wt.shape
    L = frame_len

    # frame the padded signal once (non-overlapping frames => equivalent to the
    # per-segment loop of the original module; cropped output is identical).
    # TODO(synk): a real NSGT/iSTFT inverse needs windowed overlap-add.
    n_frames = pl.cdiv(T, L)
    audio_p = jnp.pad(audio, ((0, 0), (0, 0), (0, n_frames * L - T)))
    frames = audio_p.reshape(B * C * n_frames, L)

    # row-tile the M dimension; pad rows to a multiple of the tile (mult of 16).
    N = frames.shape[0]
    tm = min(row_tile, ((N + 15) // 16) * 16)
    N_pad = pl.cdiv(N, tm) * tm
    frames = jnp.pad(frames, ((0, N_pad - N), (0, 0)))

    # fused real|imag filterbanks and stacked per-target mask weights;
    # bf16 storage, f32 accumulation in the MXU.
    wa = jnp.concatenate([wre, wim], axis=1).astype(jnp.bfloat16)     # (L, 2F)
    ws = jnp.concatenate([ire, iim], axis=0).astype(jnp.bfloat16)     # (2F, L)
    wt_all = jnp.transpose(wt, (1, 0, 2)).reshape(
        Fq, n_targets * Fq).astype(jnp.bfloat16)                       # (F, nT*F)
    bt_all = bt.reshape(1, n_targets * Fq).astype(jnp.float32)         # (1, nT*F)
    frames_b = frames.astype(jnp.bfloat16)

    grid = (N_pad // tm,)

    cost = pl.CostEstimate(
        flops=int(N_pad * (2 * L * 2 * Fq                     # analysis
                           + 2 * Fq * (n_targets * Fq)        # stacked mask nets
                           + n_targets * 2 * 2 * Fq * L)),    # synthesis
        transcendentals=int(N_pad * Fq),                      # rsqrt only
        bytes_accessed=int(frames_b.size * 2 + wa.size * 2 + ws.size * 2
                           + wt_all.size * 2 + bt_all.size * 4
                           + n_targets * N_pad * L * 2))      # bf16 writeback

    out = pl.pallas_call(
        _separator_kernel,
        out_shape=jax.ShapeDtypeStruct((n_targets, N_pad, L), jnp.bfloat16),
        grid=grid,
        in_specs=[
            pl.BlockSpec((tm, L), lambda r: (r, 0)),                    # frames (row tile)
            pl.BlockSpec((L, 2 * Fq), lambda r: (0, 0)),                # analysis [re|im]
            pl.BlockSpec((2 * Fq, L), lambda r: (0, 0)),                # synthesis [re;im]
            pl.BlockSpec((Fq, n_targets * Fq), lambda r: (0, 0)),       # stacked mask W
            pl.BlockSpec((1, n_targets * Fq), lambda r: (0, 0)),        # stacked mask b
        ],
        out_specs=pl.BlockSpec((n_targets, tm, L), lambda r: (0, r, 0)),
        scratch_shapes=[
            pltpu.VMEM((tm, 2 * Fq), jnp.bfloat16),   # unit phase X/|X| cache
            pltpu.VMEM((tm, 2 * Fq), jnp.bfloat16),   # per-target scaled complex
        ],
        compiler_params=pltpu.CompilerParams(
            dimension_semantics=("parallel",),
            vmem_limit_bytes=32 * 1024 * 1024),
        cost_estimate=cost,
    )(frames_b, wa, ws, wt_all, bt_all)

    # (n_targets, N_pad, L) -> (B, n_targets, C, T); upcast only at the end.
    y = out[:, :N].reshape(n_targets, B, C, n_frames * L)[..., :T]
    return jnp.transpose(y, (1, 0, 2, 3)).astype(jnp.float32)


if __name__ == "__main__":
    key = jax.random.PRNGKey(0)

    # small shapes consistent with the module's conventions
    B, C, T = 2, 2, 1000          # nb_samples, nb_channels (stereo), timesteps
    L = 128                       # analysis frame length  (TPU lane width)
    F = 128                       # frequency bins
    target_names = ("vocals", "drums", "bass", "other")
    n_targets = len(target_names)

    k_audio, k_w, k_b = jax.random.split(key, 3)
    audio = jax.random.normal(k_audio, (B, C, T), dtype=jnp.float32)

    # deterministic DFT-style analysis / synthesis filterbank
    n = jnp.arange(L, dtype=jnp.float32)
    k = jnp.arange(F, dtype=jnp.float32)
    ang = 2.0 * jnp.pi * jnp.outer(n, k) / L              # (L, F)
    wre = jnp.cos(ang)                                    # analysis real
    wim = -jnp.sin(ang)                                   # analysis imag
    ire = jnp.cos(ang).T / L                              # synthesis real (F, L)
    iim = -jnp.sin(ang).T / L                             # synthesis imag (F, L)

    # deterministic per-target mask-network parameters
    wt = (0.02 * jax.random.normal(k_w, (n_targets, F, F), jnp.float32)
          + 0.25 * jnp.eye(F, dtype=jnp.float32)[None])
    bt = 0.01 * jax.random.normal(k_b, (n_targets, 1, F), jnp.float32)

    est = separator_forward(audio, wre, wim, wt, bt, ire, iim, frame_len=L)
    est = jax.block_until_ready(est)

    assert est.shape == (B, n_targets, C, T), est.shape
    assert bool(jnp.all(jnp.isfinite(est)))
    print("KERNEL_OK")
</pallas_src>

<mosaic_0001>
module attributes {stable_mosaic.version = 11 : i64} {
  func.func @_separator_kernel(%arg0: i32, %arg1: memref<32x128xbf16, #tpu.memory_space<vmem>>, %arg2: memref<128x256xbf16, #tpu.memory_space<vmem>>, %arg3: memref<256x128xbf16, #tpu.memory_space<vmem>>, %arg4: memref<128x512xbf16, #tpu.memory_space<vmem>>, %arg5: memref<1x512xf32, #tpu.memory_space<vmem>>, %arg6: memref<4x32x128xbf16, #tpu.memory_space<vmem>>, %arg7: memref<32x256xbf16, #tpu.memory_space<vmem>>, %arg8: memref<32x256xbf16, #tpu.memory_space<vmem>>) attributes {dimension_semantics = [#tpu.dimension_semantics<parallel>], iteration_bounds = array<i64: 1>, scalar_prefetch = 0 : i64, scratch_operands = 2 : i64, tpu.core_type = #tpu.core_type<tc>, window_params = [{transform_indices = @transform_0, window_bounds = array<i64: 32, 128>}, {pipeline_mode = #tpu.pipeline_mode<synchronous>, transform_indices = @transform_1, window_bounds = array<i64: 128, 256>}, {pipeline_mode = #tpu.pipeline_mode<synchronous>, transform_indices = @transform_2, window_bounds = array<i64: 256, 128>}, {pipeline_mode = #tpu.pipeline_mode<synchronous>, transform_indices = @transform_3, window_bounds = array<i64: 128, 512>}, {pipeline_mode = #tpu.pipeline_mode<synchronous>, transform_indices = @transform_4, window_bounds = array<i64: 1, 512>}, {transform_indices = @transform_5, window_bounds = array<i64: 4, 32, 128>}]} {
    %c0 = arith.constant 0 : index
    %c0_0 = arith.constant 0 : index
    %0 = vector.load %arg1[%c0, %c0_0] : memref<32x128xbf16, #tpu.memory_space<vmem>>, vector<32x128xbf16>
    %c0_1 = arith.constant 0 : index
    %c0_2 = arith.constant 0 : index
    %1 = vector.load %arg2[%c0_1, %c0_2] : memref<128x256xbf16, #tpu.memory_space<vmem>>, vector<128x256xbf16>
    %cst = arith.constant dense<0.000000e+00> : vector<32x256xf32>
    %2 = tpu.matmul %0, %1, %cst {dimension_numbers = #tpu.dot_dimension_numbers<[1], [0], [0], [1], [0, 0, 1, 1], [], []>} : vector<32x128xbf16>, vector<128x256xbf16>, vector<32x256xf32> -> vector<32x256xf32>
    %3 = vector.extract_strided_slice %2 {offsets = [0, 0], sizes = [32, 128], strides = [1, 1]} : vector<32x256xf32> to vector<32x128xf32>
    %4 = vector.extract_strided_slice %2 {offsets = [0, 128], sizes = [32, 128], strides = [1, 1]} : vector<32x256xf32> to vector<32x128xf32>
    %5 = arith.mulf %3, %3 : vector<32x128xf32>
    %6 = arith.mulf %4, %4 : vector<32x128xf32>
    %7 = arith.addf %5, %6 : vector<32x128xf32>
    %cst_3 = arith.constant 9.99999996E-13 : f32
    %8 = vector.broadcast %cst_3 : f32 to vector<32x128xf32>
    %9 = arith.addf %7, %8 : vector<32x128xf32>
    %10 = math.rsqrt %9 : vector<32x128xf32>
    %11 = arith.mulf %7, %10 : vector<32x128xf32>
    %12 = arith.mulf %3, %10 : vector<32x128xf32>
    %13 = arith.truncf %12 : vector<32x128xf32> to vector<32x128xbf16>
    %c0_4 = arith.constant 0 : index
    %c0_5 = arith.constant 0 : index
    %14 = vector.load %arg7[%c0_4, %c0_5] : memref<32x256xbf16, #tpu.memory_space<vmem>>, vector<32x128xbf16>
    tpu.vector_store %arg7[%c0_4, %c0_5], %13 {strides = array<i32>} : memref<32x256xbf16, #tpu.memory_space<vmem>>, vector<32x128xbf16>,
    %15 = arith.mulf %4, %10 : vector<32x128xf32>
    %16 = arith.truncf %15 : vector<32x128xf32> to vector<32x128xbf16>
    %c0_6 = arith.constant 0 : index
    %c128 = arith.constant 128 : index
    %17 = vector.load %arg7[%c0_6, %c128] : memref<32x256xbf16, #tpu.memory_space<vmem>>, vector<32x128xbf16>
    tpu.vector_store %arg7[%c0_6, %c128], %16 {strides = array<i32>} : memref<32x256xbf16, #tpu.memory_space<vmem>>, vector<32x128xbf16>,
    %18 = arith.truncf %11 : vector<32x128xf32> to vector<32x128xbf16>
    %c0_7 = arith.constant 0 : index
    %c0_8 = arith.constant 0 : index
    %19 = vector.load %arg4[%c0_7, %c0_8] : memref<128x512xbf16, #tpu.memory_space<vmem>>, vector<128x512xbf16>
    %cst_9 = arith.constant dense<0.000000e+00> : vector<32x512xf32>
    %20 = tpu.matmul %18, %19, %cst_9 {dimension_numbers = #tpu.dot_dimension_numbers<[1], [0], [0], [1], [0, 0, 1, 1], [], []>} : vector<32x128xbf16>, vector<128x512xbf16>, vector<32x512xf32> -> vector<32x512xf32>
    %c0_10 = arith.constant 0 : index
    %c0_11 = arith.constant 0 : index
    %21 = vector.load %arg5[%c0_10, %c0_11] : memref<1x512xf32, #tpu.memory_space<vmem>>, vector<1x512xf32>
    %22 = vector.broadcast %21 : vector<1x512xf32> to vector<32x512xf32>
    %23 = arith.addf %20, %22 : vector<32x512xf32>
    %cst_12 = arith.constant 0.000000e+00 : f32
    %24 = vector.broadcast %cst_12 : f32 to vector<32x512xf32>
    %25 = arith.maximumf %23, %24 : vector<32x512xf32>
    %26 = arith.truncf %25 : vector<32x512xf32> to vector<32x512xbf16>
    %c0_13 = arith.constant 0 : index
    %c0_14 = arith.constant 0 : index
    %27 = vector.load %arg7[%c0_13, %c0_14] : memref<32x256xbf16, #tpu.memory_space<vmem>>, vector<32x256xbf16>
    %28 = vector.extract_strided_slice %26 {offsets = [0, 0], sizes = [32, 128], strides = [1, 1]} : vector<32x512xbf16> to vector<32x128xbf16>
    %29 = vector.extract_strided_slice %27 {offsets = [0, 0], sizes = [32, 128], strides = [1, 1]} : vector<32x256xbf16> to vector<32x128xbf16>
    %30 = arith.mulf %29, %28 : vector<32x128xbf16>
    %c0_15 = arith.constant 0 : index
    %c0_16 = arith.constant 0 : index
    %31 = vector.load %arg8[%c0_15, %c0_16] : memref<32x256xbf16, #tpu.memory_space<vmem>>, vector<32x128xbf16>
    tpu.vector_store %arg8[%c0_15, %c0_16], %30 {strides = array<i32>} : memref<32x256xbf16, #tpu.memory_space<vmem>>, vector<32x128xbf16>,
    %32 = vector.extract_strided_slice %27 {offsets = [0, 128], sizes = [32, 128], strides = [1, 1]} : vector<32x256xbf16> to vector<32x128xbf16>
    %33 = arith.mulf %32, %28 : vector<32x128xbf16>
    %c0_17 = arith.constant 0 : index
    %c128_18 = arith.constant 128 : index
    %34 = vector.load %arg8[%c0_17, %c128_18] : memref<32x256xbf16, #tpu.memory_space<vmem>>, vector<32x128xbf16>
    tpu.vector_store %arg8[%c0_17, %c128_18], %33 {strides = array<i32>} : memref<32x256xbf16, #tpu.memory_space<vmem>>, vector<32x128xbf16>,
    %c0_19 = arith.constant 0 : index
    %c0_20 = arith.constant 0 : index
    %35 = vector.load %arg8[%c0_19, %c0_20] : memref<32x256xbf16, #tpu.memory_space<vmem>>, vector<32x256xbf16>
    %c0_21 = arith.constant 0 : index
    %c0_22 = arith.constant 0 : index
    %36 = vector.load %arg3[%c0_21, %c0_22] : memref<256x128xbf16, #tpu.memory_space<vmem>>, vector<256x128xbf16>
    %cst_23 = arith.constant dense<0.000000e+00> : vector<32x128xf32>
    %37 = tpu.matmul %35, %36, %cst_23 {dimension_numbers = #tpu.dot_dimension_numbers<[1], [0], [0], [1], [0, 0, 1, 1], [], []>} : vector<32x256xbf16>, vector<256x128xbf16>, vector<32x128xf32> -> vector<32x128xf32>
    %38 = arith.truncf %37 : vector<32x128xf32> to vector<32x128xbf16>
    %c0_24 = arith.constant 0 : index
    %c0_25 = arith.constant 0 : index
    %c0_26 = arith.constant 0 : index
    %39 = vector.load %arg6[%c0_24, %c0_25, %c0_26] : memref<4x32x128xbf16, #tpu.memory_space<vmem>>, vector<1x32x128xbf16>
    %40 = vector.shape_cast %39 : vector<1x32x128xbf16> to vector<32x128xbf16>
    %41 = vector.shape_cast %38 : vector<32x128xbf16> to vector<1x32x128xbf16>
    tpu.vector_store %arg6[%c0_24, %c0_25, %c0_26], %41 {strides = array<i32>} : memref<4x32x128xbf16, #tpu.memory_space<vmem>>, vector<1x32x128xbf16>,
    %42 = vector.extract_strided_slice %26 {offsets = [0, 128], sizes = [32, 128], strides = [1, 1]} : vector<32x512xbf16> to vector<32x128xbf16>
    %43 = vector.extract_strided_slice %27 {offsets = [0, 0], sizes = [32, 128], strides = [1, 1]} : vector<32x256xbf16> to vector<32x128xbf16>
    %44 = arith.mulf %43, %42 : vector<32x128xbf16>
    %c0_27 = arith.constant 0 : index
    %c0_28 = arith.constant 0 : index
    %45 = vector.load %arg8[%c0_27, %c0_28] : memref<32x256xbf16, #tpu.memory_space<vmem>>, vector<32x128xbf16>
    tpu.vector_store %arg8[%c0_27, %c0_28], %44 {strides = array<i32>} : memref<32x256xbf16, #tpu.memory_space<vmem>>, vector<32x128xbf16>,
    %46 = vector.extract_strided_slice %27 {offsets = [0, 128], sizes = [32, 128], strides = [1, 1]} : vector<32x256xbf16> to vector<32x128xbf16>
    %47 = arith.mulf %46, %42 : vector<32x128xbf16>
    %c0_29 = arith.constant 0 : index
    %c128_30 = arith.constant 128 : index
    %48 = vector.load %arg8[%c0_29, %c128_30] : memref<32x256xbf16, #tpu.memory_space<vmem>>, vector<32x128xbf16>
    tpu.vector_store %arg8[%c0_29, %c128_30], %47 {strides = array<i32>} : memref<32x256xbf16, #tpu.memory_space<vmem>>, vector<32x128xbf16>,
    %c0_31 = arith.constant 0 : index
    %c0_32 = arith.constant 0 : index
    %49 = vector.load %arg8[%c0_31, %c0_32] : memref<32x256xbf16, #tpu.memory_space<vmem>>, vector<32x256xbf16>
    %c0_33 = arith.constant 0 : index
    %c0_34 = arith.constant 0 : index
    %50 = vector.load %arg3[%c0_33, %c0_34] : memref<256x128xbf16, #tpu.memory_space<vmem>>, vector<256x128xbf16>
    %cst_35 = arith.constant dense<0.000000e+00> : vector<32x128xf32>
    %51 = tpu.matmul %49, %50, %cst_35 {dimension_numbers = #tpu.dot_dimension_numbers<[1], [0], [0], [1], [0, 0, 1, 1], [], []>} : vector<32x256xbf16>, vector<256x128xbf16>, vector<32x128xf32> -> vector<32x128xf32>
    %52 = arith.truncf %51 : vector<32x128xf32> to vector<32x128xbf16>
    %c1 = arith.constant 1 : index
    %c0_36 = arith.constant 0 : index
    %c0_37 = arith.constant 0 : index
    %53 = vector.load %arg6[%c1, %c0_36, %c0_37] : memref<4x32x128xbf16, #tpu.memory_space<vmem>>, vector<1x32x128xbf16>
    %54 = vector.shape_cast %53 : vector<1x32x128xbf16> to vector<32x128xbf16>
    %55 = vector.shape_cast %52 : vector<32x128xbf16> to vector<1x32x128xbf16>
    tpu.vector_store %arg6[%c1, %c0_36, %c0_37], %55 {strides = array<i32>} : memref<4x32x128xbf16, #tpu.memory_space<vmem>>, vector<1x32x128xbf16>,
    %56 = vector.extract_strided_slice %26 {offsets = [0, 256], sizes = [32, 128], strides = [1, 1]} : vector<32x512xbf16> to vector<32x128xbf16>
    %57 = vector.extract_strided_slice %27 {offsets = [0, 0], sizes = [32, 128], strides = [1, 1]} : vector<32x256xbf16> to vector<32x128xbf16>
    %58 = arith.mulf %57, %56 : vector<32x128xbf16>
    %c0_38 = arith.constant 0 : index
    %c0_39 = arith.constant 0 : index
    %59 = vector.load %arg8[%c0_38, %c0_39] : memref<32x256xbf16, #tpu.memory_space<vmem>>, vector<32x128xbf16>
    tpu.vector_store %arg8[%c0_38, %c0_39], %58 {strides = array<i32>} : memref<32x256xbf16, #tpu.memory_space<vmem>>, vector<32x128xbf16>,
    %60 = vector.extract_strided_slice %27 {offsets = [0, 128], sizes = [32, 128], strides = [1, 1]} : vector<32x256xbf16> to vector<32x128xbf16>
    %61 = arith.mulf %60, %56 : vector<32x128xbf16>
    %c0_40 = arith.constant 0 : index
    %c128_41 = arith.constant 128 : index
    %62 = vector.load %arg8[%c0_40, %c128_41] : memref<32x256xbf16, #tpu.memory_space<vmem>>, vector<32x128xbf16>
    tpu.vector_store %arg8[%c0_40, %c128_41], %61 {strides = array<i32>} : memref<32x256xbf16, #tpu.memory_space<vmem>>, vector<32x128xbf16>,
    %c0_42 = arith.constant 0 : index
    %c0_43 = arith.constant 0 : index
    %63 = vector.load %arg8[%c0_42, %c0_43] : memref<32x256xbf16, #tpu.memory_space<vmem>>, vector<32x256xbf16>
    %c0_44 = arith.constant 0 : index
    %c0_45 = arith.constant 0 : index
    %64 = vector.load %arg3[%c0_44, %c0_45] : memref<256x128xbf16, #tpu.memory_space<vmem>>, vector<256x128xbf16>
    %cst_46 = arith.constant dense<0.000000e+00> : vector<32x128xf32>
    %65 = tpu.matmul %63, %64, %cst_46 {dimension_numbers = #tpu.dot_dimension_numbers<[1], [0], [0], [1], [0, 0, 1, 1], [], []>} : vector<32x256xbf16>, vector<256x128xbf16>, vector<32x128xf32> -> vector<32x128xf32>
    %66 = arith.truncf %65 : vector<32x128xf32> to vector<32x128xbf16>
    %c2 = arith.constant 2 : index
    %c0_47 = arith.constant 0 : index
    %c0_48 = arith.constant 0 : index
    %67 = vector.load %arg6[%c2, %c0_47, %c0_48] : memref<4x32x128xbf16, #tpu.memory_space<vmem>>, vector<1x32x128xbf16>
    %68 = vector.shape_cast %67 : vector<1x32x128xbf16> to vector<32x128xbf16>
    %69 = vector.shape_cast %66 : vector<32x128xbf16> to vector<1x32x128xbf16>
    tpu.vector_store %arg6[%c2, %c0_47, %c0_48], %69 {strides = array<i32>} : memref<4x32x128xbf16, #tpu.memory_space<vmem>>, vector<1x32x128xbf16>,
    %70 = vector.extract_strided_slice %26 {offsets = [0, 384], sizes = [32, 128], strides = [1, 1]} : vector<32x512xbf16> to vector<32x128xbf16>
    %71 = vector.extract_strided_slice %27 {offsets = [0, 0], sizes = [32, 128], strides = [1, 1]} : vector<32x256xbf16> to vector<32x128xbf16>
    %72 = arith.mulf %71, %70 : vector<32x128xbf16>
    %c0_49 = arith.constant 0 : index
    %c0_50 = arith.constant 0 : index
    %73 = vector.load %arg8[%c0_49, %c0_50] : memref<32x256xbf16, #tpu.memory_space<vmem>>, vector<32x128xbf16>
    tpu.vector_store %arg8[%c0_49, %c0_50], %72 {strides = array<i32>} : memref<32x256xbf16, #tpu.memory_space<vmem>>, vector<32x128xbf16>,
    %74 = vector.extract_strided_slice %27 {offsets = [0, 128], sizes = [32, 128], strides = [1, 1]} : vector<32x256xbf16> to vector<32x128xbf16>
    %75 = arith.mulf %74, %70 : vector<32x128xbf16>
    %c0_51 = arith.constant 0 : index
    %c128_52 = arith.constant 128 : index
    %76 = vector.load %arg8[%c0_51, %c128_52] : memref<32x256xbf16, #tpu.memory_space<vmem>>, vector<32x128xbf16>
    tpu.vector_store %arg8[%c0_51, %c128_52], %75 {strides = array<i32>} : memref<32x256xbf16, #tpu.memory_space<vmem>>, vector<32x128xbf16>,
    %c0_53 = arith.constant 0 : index
    %c0_54 = arith.constant 0 : index
    %77 = vector.load %arg8[%c0_53, %c0_54] : memref<32x256xbf16, #tpu.memory_space<vmem>>, vector<32x256xbf16>
    %c0_55 = arith.constant 0 : index
    %c0_56 = arith.constant 0 : index
    %78 = vector.load %arg3[%c0_55, %c0_56] : memref<256x128xbf16, #tpu.memory_space<vmem>>, vector<256x128xbf16>
    %cst_57 = arith.constant dense<0.000000e+00> : vector<32x128xf32>
    %79 = tpu.matmul %77, %78, %cst_57 {dimension_numbers = #tpu.dot_dimension_numbers<[1], [0], [0], [1], [0, 0, 1, 1], [], []>} : vector<32x256xbf16>, vector<256x128xbf16>, vector<32x128xf32> -> vector<32x128xf32>
    %80 = arith.truncf %79 : vector<32x128xf32> to vector<32x128xbf16>
    %c3 = arith.constant 3 : index
    %c0_58 = arith.constant 0 : index
    %c0_59 = arith.constant 0 : index
    %81 = vector.load %arg6[%c3, %c0_58, %c0_59] : memref<4x32x128xbf16, #tpu.memory_space<vmem>>, vector<1x32x128xbf16>
    %82 = vector.shape_cast %81 : vector<1x32x128xbf16> to vector<32x128xbf16>
    %83 = vector.shape_cast %80 : vector<32x128xbf16> to vector<1x32x128xbf16>
    tpu.vector_store %arg6[%c3, %c0_58, %c0_59], %83 {strides = array<i32>} : memref<4x32x128xbf16, #tpu.memory_space<vmem>>, vector<1x32x128xbf16>,
    return
  }
  func.func @transform_0(%arg0: i32) -> (i32, i32) {
    %c0_i32 = arith.constant 0 : i32
    %c0_i32_0 = arith.constant 0 : i32
    return %arg0, %c0_i32 : i32, i32
  }
  func.func @transform_1(%arg0: i32) -> (i32, i32) {
    %c0_i32 = arith.constant 0 : i32
    %c0_i32_0 = arith.constant 0 : i32
    %c0_i32_1 = arith.constant 0 : i32
    return %c0_i32, %c0_i32_0 : i32, i32
  }
  func.func @transform_2(%arg0: i32) -> (i32, i32) {
    %c0_i32 = arith.constant 0 : i32
    %c0_i32_0 = arith.constant 0 : i32
    %c0_i32_1 = arith.constant 0 : i32
    return %c0_i32, %c0_i32_0 : i32, i32
  }
  func.func @transform_3(%arg0: i32) -> (i32, i32) {
    %c0_i32 = arith.constant 0 : i32
    %c0_i32_0 = arith.constant 0 : i32
    %c0_i32_1 = arith.constant 0 : i32
    return %c0_i32, %c0_i32_0 : i32, i32
  }
  func.func @transform_4(%arg0: i32) -> (i32, i32) {
    %c0_i32 = arith.constant 0 : i32
    %c0_i32_0 = arith.constant 0 : i32
    %c0_i32_1 = arith.constant 0 : i32
    return %c0_i32, %c0_i32_0 : i32, i32
  }
  func.func @transform_5(%arg0: i32) -> (i32, i32, i32) {
    %c0_i32 = arith.constant 0 : i32
    %c0_i32_0 = arith.constant 0 : i32
    %c0_i32_1 = arith.constant 0 : i32
    return %c0_i32, %arg0, %c0_i32_0 : i32, i32, i32
  }
}

</mosaic_0001>

<bundles_post_ra>
// kernel: tpu_custom_call.1
= control target key start
LH: loop header
LB: loop body
LE: loop exit
PB: predicated region body
PF: predicated region fallthrough
CT: control target
= control target key end

     0   :  { %10 = vsyncpa [#allocation5], 0  ;;  %s2549_s0 = inlined_call_operand.hbm [shape: bf16[32,128], index: 0, kind: input, shape index: {}]   ;;  %s2550_s1 = inlined_call_operand.hbm [shape: bf16[128,256], index: 1, kind: input, shape index: {}]   ;;  %s2551_s2 = inlined_call_operand.hbm [shape: bf16[256,128], index: 2, kind: input, shape index: {}]   ;;  %s2552_s3 = inlined_call_operand.hbm [shape: bf16[128,512], index: 3, kind: input, shape index: {}]   ;;  %s2553_s4 = inlined_call_operand.vmem [shape: f32[1,512], index: 4, kind: input, shape index: {}]   ;;  %s2554_s5 = inlined_call_operand.hbm [shape: bf16[4,32,128], index: 5, kind: output, shape index: {}]  }
   0x1   :  { %11 = vsyncpa [#allocation8], 0 }
   0x2   :  { %12 = vsyncpa [#allocation11], 0 }
   0x3   :  { %13 = vsyncpa [#allocation6], 0  ;;  %s2364_s18 = smov [#allocation7]  }
   0x4   :  { %s31_s19 = sshll.u32 %s2364_s18, 4  ;;  %s32_s19 = int_to_ptr.vmem [resolvable:$true] %s31_s19 }
   0x5   :  { %s2264_s20 = scalar_lea.vmem %s32_s19, 2048  ;;  %p2269_p1 = scmp.lt.s32.totalorder %s32_s19, %s32_s19 }
   0x6   :  { %p2265_p0 = scmp.ne.s32.totalorder %s32_s19, %s2264_s20  ;;  %p2270_p2 = scmp.lt.s32.totalorder %s2264_s20, %s2264_s20 }
   0x8   :  { %p2271_p3 = por %p2270_p2, %p2269_p1 }
   0xa   :  { %p2272_p4 = pnand %p2271_p3, %p2265_p0 }
   0xc   :  { %2275 = shalt.err (!%p2272_p4)
}
   0xd   :  { %s2365_s21 = smov 128   ;;  %s2366_s22 = smov 8  }
   0xe   :  { %37 = dma.hbm_to_vmem [thread:$0]  %s2550_s1, 2048, %s32_s19, [#allocation8], %s2365_s21, %s2365_s21, %s2366_s22  }
   0xf   :  { %s2367_s25 = smov [#allocation4]  }
  0x10   :  { %s19_s26 = sshll.u32 %s2367_s25, 4  ;;  %s20_s26 = int_to_ptr.vmem [resolvable:$true] %s19_s26 }
  0x11   :  { %s2284_s27 = scalar_lea.vmem %s20_s26, 256  ;;  %p2289_p6 = scmp.lt.s32.totalorder %s20_s26, %s20_s26 }
  0x12   :  { %p2285_p5 = scmp.ne.s32.totalorder %s20_s26, %s2284_s27  ;;  %p2290_p7 = scmp.lt.s32.totalorder %s2284_s27, %s2284_s27 }
  0x14   :  { %p2291_p8 = por %p2290_p7, %p2289_p6 }
  0x16   :  { %p2292_p9 = pnand %p2291_p8, %p2285_p5 }
  0x18   :  { %2295 = shalt.err (!%p2292_p9)
}
  0x19   :  { %s2368_s28 = smov 64   ;;  %s2369_s29 = smov 4  }
  0x1a   :  { %25 = dma.hbm_to_vmem [thread:$0]  %s2549_s0, 256, %s20_s26, [#allocation5], %s2368_s28, %s2368_s28, %s2369_s29  }
  0x1b   :  { %s2370_s1 = smov [#allocation9]   ;;  %s2371_s8 = smov [#allocation10]  }
  0x1c   :  { %s43_s7 = sshll.u32 %s2370_s1, 4  ;;  %s55_s9 = sshll.u32 %s2371_s8, 4  ;;  %s44_s7 = int_to_ptr.vmem [resolvable:$true] %s43_s7  ;;  %s56_s9 = int_to_ptr.vmem [resolvable:$true] %s55_s9 }
  0x1d   :  { %s2304_s10 = scalar_lea.vmem %s44_s7, 2048  ;;  %p2309_p11 = scmp.lt.s32.totalorder %s44_s7, %s44_s7 }
  0x1e   :  { %p2305_p10 = scmp.ne.s32.totalorder %s44_s7, %s2304_s10  ;;  %p2310_p12 = scmp.lt.s32.totalorder %s2304_s10, %s2304_s10 }
  0x20   :  { %p2311_p13 = por %p2310_p12, %p2309_p11 }
  0x22   :  { %p2312_p0 = pnand %p2311_p13, %p2305_p10 }
  0x24   :  { %2315 = shalt.err (!%p2312_p0)
}
  0x25   :  { %49 = dma.hbm_to_vmem [thread:$0]  %s2551_s2, 2048, %s44_s7, [#allocation8], %s2368_s28, %s2368_s28, %s2369_s29  }
  0x26   :  { %s2324_s0 = scalar_lea.vmem %s56_s9, 4096  ;;  %p2329_p2 = scmp.lt.s32.totalorder %s56_s9, %s56_s9 }
  0x27   :  { %p2325_p1 = scmp.ne.s32.totalorder %s56_s9, %s2324_s0  ;;  %p2330_p3 = scmp.lt.s32.totalorder %s2324_s0, %s2324_s0 }
  0x29   :  { %p2331_p4 = por %p2330_p3, %p2329_p2 }
  0x2b   :  { %p2332_p5 = pnand %p2331_p4, %p2325_p1 }
  0x2d   :  { %2335 = shalt.err (!%p2332_p5)
}
  0x2e   :  { %s2372_s13 = smov 256   ;;  %s2373_s14 = smov 16  }
  0x2f   :  { %61 = dma.hbm_to_vmem [thread:$0]  %s2552_s3, 4096, %s56_s9, [#allocation11], %s2372_s13, %s2372_s13, %s2373_s14  }
  0x30   :  { %2356 = dma.done.wait [#allocation5], 256  }
  0x31   :  { %2357 = vsyncadd [#allocation5], 4294967040 }
  0x32   :  { %2358 = dma.done.wait [#allocation8], 4096  }
  0x33   :  { %2359 = vsyncadd [#allocation8], 4294963200 }
  0x34   :  { %2360 = dma.done.wait [#allocation11], 4096  }
  0x35   :  { %2361 = vsyncadd [#allocation11], 4294963200  ;;  %v2374_v0 = vmov 0   ;;  %v2096_v1 = vld [vmem:[#allocation7 + $0x74] ss:$8 sps:$4 sm:$0xff]  }
  0x36   :  { %221 = vmatprep.mubr.bf16.mxu0 %v2374_v0  ;;  %562 = vmatprep.mubr.bf16.mxu1 %v2374_v0  ;;  %v2098_v2 = vld [vmem:[#allocation7 + $0x70] ss:$8 sps:$4 sm:$0xff]   ;;  %v2099_v3 = vld [vmem:[#allocation7 + $0x64] ss:$8 sps:$4 sm:$0xff]   ;;  %v2101_v4 = vld [vmem:[#allocation7 + $0x60] ss:$8 sps:$4 sm:$0xff]  }
  0x37   :  { %189 = vmatprep.subr.bf16.mxu0 %v2096_v1  ;;  %v2102_v5 = vld [vmem:[#allocation7 + $0x54] ss:$8 sps:$4 sm:$0xff]   ;;  %v2104_v6 = vld [vmem:[#allocation7 + $0x50] ss:$8 sps:$4 sm:$0xff]   ;;  %v2105_v7 = vld [vmem:[#allocation7 + $0x44] ss:$8 sps:$4 sm:$0xff]  }
  0x38   :  { %190 = vmatpush1.bf16.msra.mxu0 %v2098_v2  ;;  %v2107_v8 = vld [vmem:[#allocation7 + $0x40] ss:$8 sps:$4 sm:$0xff]   ;;  %v2108_v9 = vld [vmem:[#allocation7 + $0x34] ss:$8 sps:$4 sm:$0xff]   ;;  %v2110_v11 = vld [vmem:[#allocation7 + $0x30] ss:$8 sps:$4 sm:$0xff]  }
  0x39   :  { %191 = vmatprep.subr.bf16.mxu0 %v2099_v3  ;;  %v2122_v10 = vld [vmem:[#allocation10 + $0xe4] ss:$16 sps:$4 sm:$0xff]   ;;  %v2113_v13 = vld [vmem:[#allocation7 + $0x20] ss:$8 sps:$4 sm:$0xff]   ;;  %v2116_v15 = vld [vmem:[#allocation7 + $0x10] ss:$8 sps:$4 sm:$0xff]  }
  0x3a   :  { %v2111_v12 = vld [vmem:[#allocation7 + $0x24] ss:$8 sps:$4 sm:$0xff]   ;;  %530 = vmatprep.subr.bf16.mxu1 %v2122_v10  ;;  %v2114_v14 = vld [vmem:[#allocation7 + $0x14] ss:$8 sps:$4 sm:$0xff]   ;;  %v2119_v17 = vld [vmem:[#allocation7] ss:$8 sps:$4 sm:$0xff]  }
  0x3b   :  { %v2117_v16 = vld [vmem:[#allocation7 + $0x4] ss:$8 sps:$4 sm:$0xff]   ;;  %v2120_v19 = vld [vmem:[#allocation4] sm:$0xff]   ;;  %v2124_v20 = vld [vmem:[#allocation10 + $0xe8] ss:$16 sps:$4 sm:$0xff]  }
  0x3c   :  { %192 = vmatpush1.bf16.msra.mxu0 %v2101_v4  ;;  %v2126_v18 = vld [vmem:[#allocation10 + $0xec] ss:$16 sps:$4 sm:$0xff]   ;;  %v2127_v22 = vld [vmem:[#allocation10 + $0xe0] ss:$16 sps:$4 sm:$0xff]   ;;  %v2128_v23 = vld [vmem:[#allocation10 + $0xc4] ss:$16 sps:$4 sm:$0xff]  }
  0x3d   :  { %193 = vmatprep.subr.bf16.mxu0 %v2102_v5  ;;  %v2121_v21 = vld [vmem:[#allocation4 + $0x8] sm:$0xff]   ;;  %531 = vmatpush1.bf16.msra.mxu1 %v2127_v22  ;;  %v2133_v26 = vld [vmem:[#allocation10 + $0xc0] ss:$16 sps:$4 sm:$0xff]   ;;  %v2134_v27 = vld [vmem:[#allocation10 + $0xa4] ss:$16 sps:$4 sm:$0xff]  }
  0x3e   :  { %v2132_v24 = vld [vmem:[#allocation10 + $0xcc] ss:$16 sps:$4 sm:$0xff]   ;;  %v2130_v25 = vld [vmem:[#allocation10 + $0xc8] ss:$16 sps:$4 sm:$0xff]   ;;  %532 = vmatprep.subr.bf16.mxu1 %v2128_v23  ;;  %v2139_v30 = vld [vmem:[#allocation10 + $0xa0] ss:$16 sps:$4 sm:$0xff]  }
  0x3f   :  { %v2138_v28 = vld [vmem:[#allocation10 + $0xac] ss:$16 sps:$4 sm:$0xff]   ;;  %v2136_v29 = vld [vmem:[#allocation10 + $0xa8] ss:$16 sps:$4 sm:$0xff]   ;;  %v2140_v31 = vld [vmem:[#allocation10 + $0x84] ss:$16 sps:$4 sm:$0xff]  }
  0x40   :  { %194 = vmatpush1.bf16.msra.mxu0 %v2104_v6  ;;  %v2144_v32 = vld [vmem:[#allocation10 + $0x8c] ss:$16 sps:$4 sm:$0xff]   ;;  %v2142_v33 = vld [vmem:[#allocation10 + $0x88] ss:$16 sps:$4 sm:$0xff]   ;;  %v2145_v34 = vld [vmem:[#allocation10 + $0x80] ss:$16 sps:$4 sm:$0xff]  }
  0x41   :  { %195 = vmatprep.subr.bf16.mxu0 %v2105_v7  ;;  %533 = vmatpush1.bf16.msra.mxu1 %v2133_v26  ;;  %v2146_v35 = vld [vmem:[#allocation10 + $0x64] ss:$16 sps:$4 sm:$0xff]   ;;  %v2150_v36 = vld [vmem:[#allocation10 + $0x6c] ss:$16 sps:$4 sm:$0xff]   ;;  %v2148_v37 = vld [vmem:[#allocation10 + $0x68] ss:$16 sps:$4 sm:$0xff]  }
  0x42   :  { %534 = vmatprep.subr.bf16.mxu1 %v2134_v27  ;;  %v2151_v38 = vld [vmem:[#allocation10 + $0x60] ss:$16 sps:$4 sm:$0xff]   ;;  %v2152_v39 = vld [vmem:[#allocation10 + $0x44] ss:$16 sps:$4 sm:$0xff]   ;;  %v2156_v40 = vld [vmem:[#allocation10 + $0x4c] ss:$16 sps:$4 sm:$0xff]  }
  0x43   :  { %v2154_v41 = vld [vmem:[#allocation10 + $0x48] ss:$16 sps:$4 sm:$0xff]   ;;  %v2157_v42 = vld [vmem:[#allocation10 + $0x40] ss:$16 sps:$4 sm:$0xff]   ;;  %v2158_v43 = vld [vmem:[#allocation10 + $0x24] ss:$16 sps:$4 sm:$0xff]  }
  0x44   :  { %196 = vmatpush1.bf16.msra.mxu0 %v2107_v8  ;;  %v2162_v44 = vld [vmem:[#allocation10 + $0x2c] ss:$16 sps:$4 sm:$0xff]   ;;  %v2160_v45 = vld [vmem:[#allocation10 + $0x28] ss:$16 sps:$4 sm:$0xff]   ;;  %v2163_v46 = vld [vmem:[#allocation10 + $0x20] ss:$16 sps:$4 sm:$0xff]  }
  0x45   :  { %197 = vmatprep.subr.bf16.mxu0 %v2108_v9  ;;  %535 = vmatpush1.bf16.msra.mxu1 %v2139_v30  ;;  %v2164_v47 = vld [vmem:[#allocation10 + $0x4] ss:$16 sps:$4 sm:$0xff]   ;;  %v2168_v48 = vld [vmem:[#allocation10 + $0xc] ss:$16 sps:$4 sm:$0xff]   ;;  %v2166_v49 = vld [vmem:[#allocation10 + $0x8] ss:$16 sps:$4 sm:$0xff]  }
  0x46   :  { %536 = vmatprep.subr.bf16.mxu1 %v2140_v31  ;;  %v2169_v50 = vld [vmem:[#allocation10] ss:$16 sps:$4 sm:$0xff]   ;;  %v2170_v51 = vld [vmem:[#allocation9 + $0x78] sm:$0xff]  }
  0x47   :  { %v2175_v52 = vld [vmem:[#allocation9 + $0x78] sm:$0xff]  }
  0x48   :  { %198 = vmatpush1.bf16.msra.mxu0 %v2110_v11  ;;  %v2171_v27 = vld [vmem:[#allocation9 + $0x38] sm:$0xff]  }
  0x49   :  { %199 = vmatprep.subr.bf16.mxu0 %v2111_v12  ;;  %537 = vmatpush1.bf16.msra.mxu1 %v2145_v34  ;;  %v2173_v34 = vld [vmem:[#allocation9 + $0x30] sm:$0xff]  }
  0x4a   :  { %538 = vmatprep.subr.bf16.mxu1 %v2146_v35 }
  0x4c   :  { %200 = vmatpush1.bf16.msra.mxu0 %v2113_v13 }
  0x4d   :  { %201 = vmatprep.subr.bf16.mxu0 %v2114_v14  ;;  %539 = vmatpush1.bf16.msra.mxu1 %v2151_v38 }
  0x4e   :  { %540 = vmatprep.subr.bf16.mxu1 %v2152_v39 }
  0x50   :  { %202 = vmatpush1.bf16.msra.mxu0 %v2116_v15 }
  0x51   :  { %203 = vmatprep.subr.bf16.mxu0 %v2117_v16  ;;  %541 = vmatpush1.bf16.msra.mxu1 %v2157_v42 }
  0x52   :  { %542 = vmatprep.subr.bf16.mxu1 %v2158_v43 }
  0x54   :  { %204 = vmatpush1.bf16.msra.mxu0 %v2119_v17 }
  0x55   :  { %583 = vmatprep.subr.bf16.mxu0 %v2126_v18  ;;  %543 = vmatpush1.bf16.msra.mxu1 %v2163_v46  ;;  %v2178_v46 = vld [vmem:[#allocation9 + $0x60] sm:$0xff]  }
  0x56   :  { %544 = vmatprep.subr.bf16.mxu1 %v2164_v47  ;;  %v2181_v47 = vld [vmem:[#allocation9 + $0x30] sm:$0xff]  }
  0x57   :  { %222 = vmatmul.mubr.bf16.vlgmr.msra.gmra.mxu0 %v2120_v19 }
  0x58   :  { %231 = vmatprep.mubr.bf16.mxu0 %v2374_v0  ;;  %584 = vmatpush1.bf16.msra.mxu0 %v2124_v20 }
  0x59   :  { %585 = vmatprep.subr.bf16.mxu0 %v2132_v24  ;;  %545 = vmatpush1.bf16.msra.mxu1 %v2169_v50  ;;  %v2182_v50 = vld [vmem:[#allocation9 + $0x58] sm:$0xff]  }
  0x5a   :  { %1956 = vmatprep.subr.bf16.mxu1 %v2170_v51  ;;  %v2185_v51 = vld [vmem:[#allocation9 + $0x28] sm:$0xff]  }
  0x5c   :  { %586 = vmatpush1.bf16.msra.mxu0 %v2130_v25 }
  0x5d   :  { %587 = vmatprep.subr.bf16.mxu0 %v2138_v28 }
  0x5f   :  { %232 = vmatmul.mubr.bf16.gmra.mxu0 %v2121_v21 }
  0x60   :  { %615 = vmatprep.mubr.bf16.mxu0 %v2374_v0  ;;  %588 = vmatpush1.bf16.msra.mxu0 %v2136_v29  ;;  %v2172_v29 = vld [vmem:[#allocation9 + $0x70] sm:$0xff]  }
  0x61   :  { %589 = vmatprep.subr.bf16.mxu0 %v2144_v32 }
  0x64   :  { %590 = vmatpush1.bf16.msra.mxu0 %v2142_v33 }
  0x65   :  { %591 = vmatprep.subr.bf16.mxu0 %v2150_v36  ;;  %v2174_v36 = vld [vmem:[#allocation9 + $0x68] sm:$0xff]  }
  0x68   :  { %592 = vmatpush1.bf16.msra.mxu0 %v2148_v37 }
  0x69   :  { %593 = vmatprep.subr.bf16.mxu0 %v2156_v40 }
  0x6c   :  { %594 = vmatpush1.bf16.msra.mxu0 %v2154_v41 }
  0x6d   :  { %595 = vmatprep.subr.bf16.mxu0 %v2162_v44  ;;  %v2176_v44 = vld [vmem:[#allocation9 + $0x28] sm:$0xff]  }
  0x70   :  { %596 = vmatpush1.bf16.msra.mxu0 %v2160_v45  ;;  %v2179_v45 = vld [vmem:[#allocation9 + $0x70] sm:$0xff]  }
  0x71   :  { %597 = vmatprep.subr.bf16.mxu0 %v2168_v48  ;;  %v2180_v48 = vld [vmem:[#allocation9 + $0x20] sm:$0xff]  }
  0x74   :  { %598 = vmatpush1.bf16.msra.mxu0 %v2166_v49  ;;  %v2183_v49 = vld [vmem:[#allocation9 + $0x68] sm:$0xff]  }
  0x75   :  { %1984 = vmatprep.subr.bf16.mxu0 %v2175_v52  ;;  %v2184_v52 = vld [vmem:[#allocation9 + $0x18] sm:$0xff]  }
 0x117   :  { %v223_v53 = vpop.f32.mrf.mxu0 }
 0x118   :  { %v242_v55 = vmul.f32 %v223_v53, %v223_v53 }
 0x119   :  { %v225_v54 = vpop.f32.mrf.mxu0 }
 0x11a   :  { %v246_v56 = vmul.f32 %v225_v54, %v225_v54 }
 0x11b   :  { %v227_v57 = vpop.f32.mrf.mxu0 }
 0x11c   :  { %v250_v58 = vadd.f32 %v246_v56, %v242_v55  ;;  %v243_v61 = vmul.f32 %v227_v57, %v227_v57  ;;  %v2189_v55 = vld [vmem:[#allocation9 + $0x20] sm:$0xff]   ;;  %v2188_v56 = vld [vmem:[#allocation9 + $0x10] sm:$0xff]  }
 0x11d   :  { %v229_v59 = vpop.f32.mrf.mxu0 }
 0x11e   :  { %v254_v60 = vadd.f32 1e-12, %v250_v58  ;;  %v247_v62 = vmul.f32 %v229_v59, %v229_v59 }
 0x11f   :  { %v233_v63 = vpop.f32.mrf.mxu0 }
 0x120   :  { %2248 = vrsqrt.f32 %v254_v60  ;;  %v251_v1 = vadd.f32 %v247_v62, %v243_v61  ;;  %v244_v2 = vmul.f32 %v233_v63, %v233_v63  ;;  %v2192_v60 = vld [vmem:[#allocation9 + $0x8] sm:$0xff]   ;;  %v2195_v61 = vld [vmem:[#allocation9 + $0x50] sm:$0xff]   ;;  %v2194_v62 = vld [vmem:[#allocation9 + $0x40] sm:$0xff]  }
 0x121   :  { %v235_v3 = vpop.f32.mrf.mxu0 }
 0x122   :  { %v255_v4 = vadd.f32 1e-12, %v251_v1  ;;  %v248_v5 = vmul.f32 %v235_v3, %v235_v3 }
 0x123   :  { %v237_v6 = vpop.f32.mrf.mxu0 }
 0x124   :  { %2250 = vrsqrt.f32 %v255_v4  ;;  %v252_v7 = vadd.f32 %v248_v5, %v244_v2  ;;  %v245_v8 = vmul.f32 %v237_v6, %v237_v6  ;;  %v2198_v2 = vld [vmem:[#allocation9 + $0x48] sm:$0xff]   ;;  %v2202_v5 = vld [vmem:[#allocation9 + $0x40] sm:$0xff]  }
 0x125   :  { %v239_v9 = vpop.f32.mrf.mxu0  ;;  %v2200_v4 = vld [vmem:[#allocation9 + $0x8] sm:$0xff]  }
 0x126   :  { %v256_v10 = vadd.f32 1e-12, %v252_v7  ;;  %v249_v11 = vmul.f32 %v239_v9, %v239_v9 }
 0x128   :  { %2252 = vrsqrt.f32 %v256_v10  ;;  %v253_v12 = vadd.f32 %v249_v11, %v245_v8  ;;  %v350_v8 = vlaneseq  ;;  %v2439_v11 = vld [vmem:[%s2553_s4] sm:$0xf]  ;;  %s2375_s4 = smov [#allocation12]  }
 0x129   :  { %s1688_s17 = sshll.u32 %s2375_s4, 4  ;;  %s1689_s17 = int_to_ptr.vmem [resolvable:$true] %s1688_s17 }
 0x12a   :  { %v257_v13 = vadd.f32 1e-12, %v253_v12  ;;  %s2336_s18 = scalar_lea.vmem %s1689_s17, 1024  ;;  %p2341_p7 = scmp.lt.s32.totalorder %s1689_s17, %s1689_s17 }
 0x12b   :  { %p2337_p6 = scmp.ne.s32.totalorder %s1689_s17, %s2336_s18  ;;  %p2342_p8 = scmp.lt.s32.totalorder %s2336_s18, %s2336_s18 }
 0x12c   :  { %2254 = vrsqrt.f32 %v257_v13 }
 0x12d   :  { %v2249_v14 = vpop.eup %2248  ;;  %p2343_p9 = por %p2342_p8, %p2341_p7 }
 0x12e   :  { %v266_v15 = vmul.f32 %v2249_v14, %v223_v53  ;;  %v290_v16 = vmul.f32 %v2249_v14, %v225_v54  ;;  %v262_v20 = vmul.f32 %v2249_v14, %v250_v58  ;;  %v2187_v53 = vld [vmem:[#allocation9 + $0x60] sm:$0xff]   ;;  %v2186_v54 = vld [vmem:[#allocation9 + $0x50] sm:$0xff]   ;;  %v2190_v58 = vld [vmem:[#allocation9 + $0x48] sm:$0xff]  }
 0x12f   :  { %p2344_p10 = pnand %p2343_p9, %p2337_p6 }
 0x130   :  { %v1872_v17 = vpack.c.bf16 %v266_v15, %v266_v15  ;;  %v1876_v18 = vpack.c.bf16 %v290_v16, %v290_v16 }
 0x131   :  { %v2251_v19 = vpop.eup %2250 }
 0x132   :  { %286 = vst [vmem:[#allocation2] sm:$0xf] %v1872_v17  ;;  %310 = vst [vmem:[#allocation2 + $0x4] sm:$0xf] %v1876_v18  ;;  %v263_v21 = vmul.f32 %v2251_v19, %v251_v1  ;;  %v267_v22 = vmul.f32 %v2251_v19, %v227_v57  ;;  %v291_v23 = vmul.f32 %v2251_v19, %v229_v59  ;;  %v2191_v57 = vld [vmem:[#allocation9 + $0x58] sm:$0xff]   ;;  %v2196_v1 = vld [vmem:[#allocation9] sm:$0xff]  }
 0x133   :  { %v2193_v59 = vld [vmem:[#allocation9 + $0x18] sm:$0xff]  }
 0x134   :  { %v1873_v24 = vpack.c.bf16 %v267_v22, %v267_v22  ;;  %v1877_v25 = vpack.c.bf16 %v291_v23, %v291_v23  ;;  %v314_v26 = vpack.c.bf16 %v263_v21, %v262_v20 }
 0x135   :  { %v2253_v28 = vpop.eup %2252 }
 0x136   :  { %287 = vst [vmem:[#allocation2 + $0x8] sm:$0xf] %v1873_v24  ;;  %311 = vst [vmem:[#allocation2 + $0xc] sm:$0xf] %v1877_v25  ;;  %v268_v30 = vmul.f32 %v2253_v28, %v233_v63  ;;  %v292_v31 = vmul.f32 %v2253_v28, %v235_v3  ;;  %563 = vmatmul.mubr.bf16.vlgmr.msra.gmra.mxu1 %v314_v26  ;;  %616 = vmatmul.mubr.bf16.vlgmr.msra.gmra.mxu0 %v314_v26  ;;  %v2197_v63 = vld [vmem:[#allocation9 + $0x10] sm:$0xff]   ;;  %v2199_v3 = vld [vmem:[#allocation9 + $0x78] sm:$0xff]  }
 0x137   :  { %572 = vmatprep.mubr.bf16.mxu1 %v2374_v0  ;;  %625 = vmatprep.mubr.bf16.mxu0 %v2374_v0  ;;  %v264_v37 = vmul.f32 %v2253_v28, %v252_v7  ;;  %v2177_v0 = vld [vmem:[#allocation9 + $0x38] sm:$0xff]  }
 0x138   :  { %v1874_v32 = vpack.c.bf16 %v268_v30, %v268_v30  ;;  %v1878_v33 = vpack.c.bf16 %v292_v31, %v292_v31  ;;  %1957 = vmatpush3.bf16.msra.mxu1 %v2171_v27  ;;  %1985 = vmatpush3.bf16.msra.mxu0 %v2177_v0  ;;  %v2430_v7 = vld [vmem:[#allocation9 + $0x78] sm:$0xff]  }
 0x139   :  { %v2255_v35 = vpop.eup %2254  ;;  %1958 = vmatprep.subr.bf16.mxu1 %v2172_v29  ;;  %1986 = vmatprep.subr.bf16.mxu0 %v2179_v45  ;;  %v2444_v18 = vld [vmem:[#allocation2] sm:$0xff] }
 0x13a   :  { %288 = vst [vmem:[#allocation2 + $0x10] sm:$0xf] %v1874_v32  ;;  %312 = vst [vmem:[#allocation2 + $0x14] sm:$0xf] %v1878_v33  ;;  %v265_v38 = vmul.f32 %v2255_v35, %v253_v12  ;;  %v269_v39 = vmul.f32 %v2255_v35, %v237_v6  ;;  %v293_v40 = vmul.f32 %v2255_v35, %v239_v9  ;;  %v2204_v6 = vld [vmem:[#allocation9] sm:$0xff]   ;;  %v2433_v9 = vshrl.u32 %v350_v8, 7 }
 0x13b   :  { %v2449_v25 = vrot.slane %v2444_v18, 4 }
 0x13c   :  { %v1875_v41 = vpack.c.bf16 %v269_v39, %v269_v39  ;;  %v1879_v42 = vpack.c.bf16 %v293_v40, %v293_v40  ;;  %v315_v43 = vpack.c.bf16 %v265_v38, %v264_v37  ;;  %1959 = vmatpush3.bf16.msra.mxu1 %v2173_v34  ;;  %1987 = vmatpush3.bf16.msra.mxu0 %v2181_v47  ;;  %v352_v10 = vsub.s32 0, %v2433_v9 }
 0x13d   :  { %1960 = vmatprep.subr.bf16.mxu1 %v2174_v36  ;;  %1988 = vmatprep.subr.bf16.mxu0 %v2183_v49  ;;  %v356_v12 = vsub.s32 1, %v2433_v9  ;;  %v360_v31 = vsub.s32 2, %v2433_v9  ;;  %v2454_v33 = vld [vmem:[#allocation2 + $0x8] sm:$0xff] }
 0x13e   :  { %289 = vst [vmem:[#allocation2 + $0x18] sm:$0xf] %v1875_v41  ;;  %313 = vst [vmem:[#allocation2 + $0x1c] sm:$0xf] %v1879_v42  ;;  %573 = vmatmul.mubr.bf16.gmra.mxu1 %v315_v43  ;;  %626 = vmatmul.mubr.bf16.gmra.mxu0 %v315_v43  ;;  %v353_v13 = vrot.slane %v2439_v11, %v352_v10  ;;  %v2457_v41 = vrot.slane %v2454_v33, 4 }
 0x13f   :  { %v357_v14 = vrot.slane %v2439_v11, %v356_v12  ;;  %v2460_v42 = vrot.slane %v2439_v11, %v360_v31 }
 0x140   :  { %1961 = vmatpush3.bf16.msra.mxu1 %v2176_v44  ;;  %1989 = vmatpush3.bf16.msra.mxu0 %v2185_v51 }
 0x141   :  { %1962 = vmatprep.subr.bf16.mxu1 %v2178_v46  ;;  %1990 = vmatprep.subr.bf16.mxu0 %v2187_v53  ;;  %v2462_v44 = vld [vmem:[#allocation2 + $0x10] sm:$0xff] }
 0x142   :  { %v2469_v53 = vrot.slane %v2462_v44, 4 }
 0x144   :  { %1963 = vmatpush3.bf16.msra.mxu1 %v2180_v48  ;;  %1991 = vmatpush3.bf16.msra.mxu0 %v2189_v55 }
 0x145   :  { %1964 = vmatprep.subr.bf16.mxu1 %v2182_v50  ;;  %1992 = vmatprep.subr.bf16.mxu0 %v2191_v57  ;;  %v364_v57 = vsub.s32 3, %v2433_v9 }
 0x148   :  { %1965 = vmatpush3.bf16.msra.mxu1 %v2184_v52  ;;  %1993 = vmatpush3.bf16.msra.mxu0 %v2193_v59 }
 0x149   :  { %1966 = vmatprep.subr.bf16.mxu1 %v2186_v54  ;;  %1994 = vmatprep.subr.bf16.mxu0 %v2195_v61 }
 0x14c   :  { %1967 = vmatpush3.bf16.msra.mxu1 %v2188_v56  ;;  %1995 = vmatpush3.bf16.msra.mxu0 %v2197_v63 }
 0x14d   :  { %1968 = vmatprep.subr.bf16.mxu1 %v2190_v58  ;;  %1996 = vmatprep.subr.bf16.mxu0 %v2198_v2  ;;  %v2476_v2 = vld [vmem:[#allocation2 + $0x18] sm:$0xff] }
 0x14e   :  { %v2484_v10 = vrot.slane %v2476_v2, 4 }
 0x150   :  { %1969 = vmatpush3.bf16.msra.mxu1 %v2192_v60  ;;  %1997 = vmatpush3.bf16.msra.mxu0 %v2200_v4 }
 0x151   :  { %1970 = vmatprep.subr.bf16.mxu1 %v2194_v62  ;;  %1998 = vmatprep.subr.bf16.mxu0 %v2202_v5 }
 0x154   :  { %1971 = vmatpush3.bf16.msra.mxu1 %v2196_v1  ;;  %1999 = vmatpush3.bf16.msra.mxu0 %v2204_v6  ;;  %v2479_v6 = vrot.slane %v2439_v11, %v364_v57 }
 0x155   :  { %2012 = vmatprep.subr.bf16.mxu1 %v2199_v3  ;;  %2040 = vmatprep.subr.bf16.mxu0 %v2430_v7 }
 0x1f6   :  { %v564_v15 = vpop.f32.mrf.mxu1  ;;  %v617_v16 = vpop.f32.mrf.mxu0 }
 0x1f7   :  { %v565_v17 = vadd.f32 %v564_v15, %v353_v13  ;;  %v618_v55 = vadd.f32 %v617_v16, %v2460_v42 }
 0x1f8   :  { %v566_v19 = vpop.f32.mrf.mxu1  ;;  %v2446_v22 = vpop.f32.mrf.mxu0 }
 0x1f9   :  { %v636_v20 = vmax.f32 %v565_v17, 0.0  ;;  %v567_v21 = vadd.f32 %v566_v19, %v357_v14  ;;  %v638_v5 = vmax.f32 %v618_v55, 0.0 }
 0x1fa   :  { %v568_v23 = vpop.f32.mrf.mxu1  ;;  %v621_v34 = vpop.f32.mrf.mxu0 }
 0x1fb   :  { %v1880_v24 = vpack.c.bf16 %v636_v20, %v636_v20  ;;  %v569_v26 = vadd.f32 %v568_v23, %v353_v13  ;;  %v637_v30 = vmax.f32 %v567_v21, 0.0  ;;  %v622_v58 = vadd.f32 %v621_v34, %v2460_v42 }
 0x1fc   :  { %v570_v27 = vpop.f32.mrf.mxu1  ;;  %v623_v43 = vpop.f32.mrf.mxu0  ;;  %v1896_v20 = vpack.c.bf16 %v638_v5, %v638_v5  ;;  %v620_v21 = vadd.f32 %v2446_v22, %v2479_v6  ;;  %v2510_v5 = vld [vmem:[#allocation9 + $0x30] sm:$0xff]  }
 0x1fd   :  { %v678_v28 = vmul.bf16 %v1880_v24, %v2444_v18  ;;  %v698_v29 = vmul.bf16 %v1880_v24, %v2449_v25  ;;  %v640_v32 = vmax.f32 %v569_v26, 0.0  ;;  %v571_v36 = vadd.f32 %v570_v27, %v357_v14  ;;  %v2201_v27 = vld [vmem:[#allocation9 + $0x38] sm:$0xff]  }
 0x1fe   :  { %v574_v35 = vpop.f32.mrf.mxu1  ;;  %v1888_v39 = vpack.c.bf16 %v637_v30, %v637_v30  ;;  %v627_v59 = vpop.f32.mrf.mxu0  ;;  %v642_v8 = vmax.f32 %v622_v58, 0.0 }
 0x1ff   :  { %682 = vst [vmem:[#allocation3] sm:$0xf] %v678_v28  ;;  %702 = vst [vmem:[#allocation3 + $0x4] sm:$0xf] %v698_v29  ;;  %v575_v37 = vadd.f32 %v574_v35, %v353_v13  ;;  %v1881_v40 = vpack.c.bf16 %v640_v32, %v640_v32  ;;  %v641_v48 = vmax.f32 %v571_v36, 0.0  ;;  %v624_v29 = vadd.f32 %v623_v43, %v2479_v6  ;;  %v2203_v32 = vld [vmem:[#allocation9 + $0x70] sm:$0xff]  }
 0x200   :  { %v576_v38 = vpop.f32.mrf.mxu1  ;;  %v941_v51 = vmul.bf16 %v1888_v39, %v2444_v18  ;;  %v949_v52 = vmul.bf16 %v1888_v39, %v2449_v25  ;;  %v2481_v9 = vpop.f32.mrf.mxu0  ;;  %v1897_v28 = vpack.c.bf16 %v642_v8, %v642_v8  ;;  %v628_v34 = vadd.f32 %v627_v59, %v2460_v42  ;;  %v2205_v39 = vld [vmem:[#allocation9 + $0x30] sm:$0xff]  }
 0x201   :  { %v644_v0 = vmax.f32 %v575_v37, 0.0  ;;  %v679_v46 = vmul.bf16 %v1881_v40, %v2454_v33  ;;  %v699_v47 = vmul.bf16 %v1881_v40, %v2457_v41  ;;  %v577_v49 = vadd.f32 %v576_v38, %v357_v14 }
 0x202   :  { %v578_v45 = vpop.f32.mrf.mxu1  ;;  %v1889_v61 = vpack.c.bf16 %v641_v48, %v641_v48  ;;  %v631_v23 = vpop.f32.mrf.mxu0  ;;  %v1193_v37 = vmul.bf16 %v1896_v20, %v2444_v18  ;;  %v639_v38 = vmax.f32 %v620_v21, 0.0  ;;  %v1201_v40 = vmul.bf16 %v1896_v20, %v2449_v25 }
 0x203   :  { %v1882_v50 = vpack.c.bf16 %v644_v0, %v644_v0  ;;  %683 = vst [vmem:[#allocation3 + $0x8] sm:$0xf] %v679_v46  ;;  %703 = vst [vmem:[#allocation3 + $0xc] sm:$0xf] %v699_v47  ;;  %v579_v54 = vadd.f32 %v578_v45, %v353_v13  ;;  %v645_v1 = vmax.f32 %v577_v49, 0.0  ;;  %v632_v22 = vadd.f32 %v631_v23, %v2460_v42  ;;  %v2208_v46 = vld [vmem:[#allocation9 + $0x68] sm:$0xff]  }
 0x204   :  { %v580_v60 = vpop.f32.mrf.mxu1  ;;  %v942_v12 = vmul.bf16 %v1889_v61, %v2454_v33  ;;  %v950_v13 = vmul.bf16 %v1889_v61, %v2457_v41  ;;  %v1194_v43 = vmul.bf16 %v1897_v28, %v2454_v33  ;;  %v1202_v0 = vmul.bf16 %v1897_v28, %v2457_v41  ;;  %v2501_v47 = vld [vmem:[#allocation9 + $0x38] sm:$0xff]   ;;  %v633_v59 = vpop.f32.mrf.mxu0 }
 0x205   :  { %v680_v62 = vmul.bf16 %v1882_v50, %v2462_v44  ;;  %v700_v63 = vmul.bf16 %v1882_v50, %v2469_v53  ;;  %v648_v3 = vmax.f32 %v579_v54, 0.0  ;;  %v581_v4 = vadd.f32 %v580_v60, %v357_v14  ;;  %v2222_v28 = vld [vmem:[#allocation9 + $0x18] sm:$0xff]  }
 0x206   :  { %v706_v56 = vld [vmem:[#allocation3] sm:$0xff]  ;;  %v1890_v15 = vpack.c.bf16 %v645_v1, %v645_v1  ;;  %v643_v45 = vmax.f32 %v624_v29, 0.0  ;;  %v646_v48 = vmax.f32 %v628_v34, 0.0  ;;  %v1904_v57 = vpack.c.bf16 %v639_v38, %v639_v38  ;;  %v2528_v29 = vld [vmem:[#allocation9 + $0x60] sm:$0xff]  }
 0x207   :  { %945 = vst [vmem:[#allocation3] sm:$0xf] %v941_v51  ;;  %953 = vst [vmem:[#allocation3 + $0x4] sm:$0xf] %v949_v52  ;;  %v1883_v16 = vpack.c.bf16 %v648_v3, %v648_v3  ;;  %v649_v19 = vmax.f32 %v581_v4, 0.0  ;;  %v650_v51 = vmax.f32 %v632_v22, 0.0  ;;  %v630_v3 = vadd.f32 %v2481_v9, %v2479_v6 }
 0x208   :  { %684 = vst [vmem:[#allocation3 + $0x10] sm:$0xf] %v680_v62  ;;  %704 = vst [vmem:[#allocation3 + $0x14] sm:$0xf] %v700_v63  ;;  %v943_v30 = vmul.bf16 %v1890_v15, %v2462_v44  ;;  %v951_v31 = vmul.bf16 %v1890_v15, %v2469_v53  ;;  %v1905_v60 = vpack.c.bf16 %v643_v45, %v643_v45  ;;  %v2210_v63 = vld [vmem:[#allocation9 + $0x28] sm:$0xff]   ;;  %v2212_v4 = vld [vmem:[#allocation9 + $0x60] sm:$0xff]  }
 0x209   :  { %v681_v14 = vmul.bf16 %v1883_v16, %v2476_v2  ;;  %v701_v11 = vmul.bf16 %v1883_v16, %v2484_v10  ;;  %v1891_v36 = vpack.c.bf16 %v649_v19, %v649_v19  ;;  %v1898_v1 = vpack.c.bf16 %v646_v48, %v646_v48  ;;  %v2227_v34 = vld [vmem:[#allocation9 + $0x20] sm:$0xff]   ;;  %v2229_v22 = vld [vmem:[#allocation9 + $0x58] sm:$0xff]   ;;  %v2236_v48 = vld [vmem:[#allocation9 + $0x50] sm:$0xff]  }
 0x20a   :  { %v707_v17 = vld [vmem:[#allocation3 + $0x8] sm:$0xff]  ;;  %v1899_v8 = vpack.c.bf16 %v650_v51, %v650_v51  ;;  %v1445_v15 = vmul.bf16 %v1904_v57, %v2444_v18  ;;  %v1453_v16 = vmul.bf16 %v1904_v57, %v2449_v25  ;;  %v1446_v9 = vmul.bf16 %v1905_v60, %v2454_v33  ;;  %v2526_v33 = vld [vmem:[#allocation9 + $0x28] sm:$0xff]  }
 0x20b   :  { %946 = vst [vmem:[#allocation3 + $0x8] sm:$0xf] %v942_v12  ;;  %954 = vst [vmem:[#allocation3 + $0xc] sm:$0xf] %v950_v13  ;;  %v1765_v24 = vcombine.high %v706_v56, %v707_v17  ;;  %v1764_v26 = vcombine.low %v706_v56, %v707_v17  ;;  %v944_v52 = vmul.bf16 %v1891_v36, %v2476_v2  ;;  %v2505_v56 = vld [vmem:[#allocation9 + $0x70] sm:$0xff]   ;;  %v2514_v13 = vld [vmem:[#allocation9 + $0x68] sm:$0xff]  }
 0x20c   :  { %685 = vst [vmem:[#allocation3 + $0x18] sm:$0xf] %v681_v14  ;;  %705 = vst [vmem:[#allocation3 + $0x1c] sm:$0xf] %v701_v11  ;;  %v952_v54 = vmul.bf16 %v1891_v36, %v2484_v10  ;;  %v634_v12 = vadd.f32 %v633_v59, %v2479_v6  ;;  %v1454_v17 = vmul.bf16 %v1905_v60, %v2457_v41  ;;  %v2214_v14 = vld [vmem:[#allocation9 + $0x20] sm:$0xff]   ;;  %v647_v19 = vmax.f32 %v630_v3, 0.0 }
 0x20d   :  { %890 = vmatprep.mubr.bf16.mxu1 %v1765_v24  ;;  %v1195_v11 = vmul.bf16 %v1898_v1, %v2462_v44  ;;  %v2218_v6 = vld [vmem:[#allocation9 + $0x58] sm:$0xff]   ;;  %v1203_v21 = vmul.bf16 %v1898_v1, %v2469_v53  ;;  %v1196_v18 = vmul.bf16 %v1899_v8, %v2476_v2  ;;  %v1204_v25 = vmul.bf16 %v1899_v8, %v2484_v10  ;;  %v2228_v36 = vld [vmem:[#allocation9 + $0x48] sm:$0xff]  }
 0x20e   :  { %891 = vmatmul.mubr.bf16.vlgmr.msra.gmra.mxu1 %v1764_v26  ;;  %v957_v42 = vld [vmem:[#allocation3] sm:$0xff]  ;;  %v651_v23 = vmax.f32 %v634_v12, 0.0 }
 0x20f   :  { %v708_v35 = vld [vmem:[#allocation3 + $0x10] sm:$0xff]  ;;  %2013 = vmatpush3.bf16.msra.mxu1 %v2201_v27  ;;  %1197 = vst [vmem:[#allocation3] sm:$0xf] %v1193_v37 }
 0x210   :  { %947 = vst [vmem:[#allocation3 + $0x10] sm:$0xf] %v943_v30  ;;  %955 = vst [vmem:[#allocation3 + $0x14] sm:$0xf] %v951_v31  ;;  %2014 = vmatprep.subr.bf16.mxu1 %v2203_v32  ;;  %v2224_v30 = vld [vmem:[#allocation9 + $0x50] sm:$0xff]   ;;  %v1906_v31 = vpack.c.bf16 %v647_v19, %v647_v19  ;;  %v1907_v32 = vpack.c.bf16 %v651_v23, %v651_v23 }
 0x211   :  { %1449 = vst [vmem:[#allocation3] sm:$0xf] %v1445_v15 }
 0x212   :  { %v958_v49 = vld [vmem:[#allocation3 + $0x8] sm:$0xff]  ;;  %v1447_v37 = vmul.bf16 %v1906_v31, %v2462_v44  ;;  %v1455_v38 = vmul.bf16 %v1906_v31, %v2469_v53  ;;  %v2235_v44 = vld [vmem:[#allocation9 + $0x40] sm:$0xff]   ;;  %v2238_v53 = vld [vmem:[#allocation9 + $0x10] sm:$0xff]  }
 0x213   :  { %v2206_v50 = vld [vmem:[#allocation3 + $0x4] ss:$8 sps:$4 sm:$0xff]   ;;  %1198 = vst [vmem:[#allocation3 + $0x8] sm:$0xf] %v1194_v43  ;;  %v1792_v55 = vcombine.low %v957_v42, %v958_v49  ;;  %v709_v58 = vld [vmem:[#allocation3 + $0x18] sm:$0xff]  ;;  %2015 = vmatpush3.bf16.msra.mxu1 %v2205_v39  ;;  %v1448_v39 = vmul.bf16 %v1907_v32, %v2476_v2  ;;  %v2237_v2 = vld [vmem:[#allocation9] sm:$0xff]  }
 0x214   :  { %1205 = vst [vmem:[#allocation3 + $0x4] sm:$0xf] %v1201_v40  ;;  %1206 = vst [vmem:[#allocation3 + $0xc] sm:$0xf] %v1202_v0  ;;  %1141 = vmatprep.mubr.bf16.mxu0 %v2206_v50  ;;  %v1767_v61 = vcombine.high %v708_v35, %v709_v58  ;;  %2016 = vmatprep.subr.bf16.mxu1 %v2208_v46  ;;  %v1766_v62 = vcombine.low %v708_v35, %v709_v58  ;;  %v2226_v35 = vld [vmem:[#allocation9 + $0x10] sm:$0xff]   ;;  %v2234_v0 = vld [vmem:[#allocation9 + $0x18] sm:$0xff]  }
 0x215   :  { %948 = vst [vmem:[#allocation3 + $0x18] sm:$0xf] %v944_v52  ;;  %956 = vst [vmem:[#allocation3 + $0x1c] sm:$0xf] %v952_v54  ;;  %1142 = vmatmul.mubr.bf16.vlgmr.msra.gmra.mxu0 %v1792_v55  ;;  %v1456_v40 = vmul.bf16 %v1907_v32, %v2484_v10  ;;  %v2233_v46 = vld [vmem:[#allocation9 + $0x8] sm:$0xff]   ;;  %v2243_v52 = vld [vmem:[#allocation9 + $0x40] sm:$0xff]  }
 0x216   :  { %2041 = vmatpush3.bf16.msra.mxu0 %v2501_v47  ;;  %898 = vmatprep.mubr.bf16.mxu1 %v1767_v61  ;;  %1450 = vst [vmem:[#allocation3 + $0x8] sm:$0xf] %v1446_v9  ;;  %v2239_v10 = vld [vmem:[#allocation9 + $0x48] sm:$0xff]   ;;  %v2244_v54 = vld [vmem:[#allocation9] sm:$0xff]  }
 0x217   :  { %2042 = vmatprep.subr.bf16.mxu0 %v2505_v56  ;;  %899 = vmatmul.mubr.bf16.gmra.mxu1 %v1766_v62  ;;  %v959_v41 = vld [vmem:[#allocation3 + $0x10] sm:$0xff]  ;;  %v2242_v50 = vld [vmem:[#allocation9 + $0x8] sm:$0xff]  }
 0x218   :  { %2017 = vmatpush3.bf16.msra.mxu1 %v2210_v63  ;;  %1199 = vst [vmem:[#allocation3 + $0x10] sm:$0xf] %v1195_v11 }
 0x219   :  { %2018 = vmatprep.subr.bf16.mxu1 %v2212_v4  ;;  %1451 = vst [vmem:[#allocation3 + $0x10] sm:$0xf] %v1447_v37 }
 0x21a   :  { %2043 = vmatpush3.bf16.msra.mxu0 %v2510_v5 }
 0x21b   :  { %v2219_v20 = vld [vmem:[#allocation3 + $0x4] ss:$8 sps:$4 sm:$0xff]   ;;  %2044 = vmatprep.subr.bf16.mxu0 %v2514_v13 }
 0x21c   :  { %1457 = vst [vmem:[#allocation3 + $0x4] sm:$0xf] %v1453_v16  ;;  %1458 = vst [vmem:[#allocation3 + $0xc] sm:$0xf] %v1454_v17  ;;  %v960_v24 = vld [vmem:[#allocation3 + $0x18] sm:$0xff]  ;;  %1393 = vmatprep.mubr.bf16.mxu1 %v2219_v20  ;;  %2019 = vmatpush3.bf16.msra.mxu1 %v2214_v14 }
 0x21d   :  { %v2216_v26 = vld [vmem:[#allocation3 + $0x14] ss:$8 sps:$4 sm:$0xff]   ;;  %1200 = vst [vmem:[#allocation3 + $0x18] sm:$0xf] %v1196_v18  ;;  %v1794_v27 = vcombine.low %v959_v41, %v960_v24  ;;  %2020 = vmatprep.subr.bf16.mxu1 %v2218_v6  ;;  %v2230_v58 = vld [vmem:[#allocation3] ss:$8 sps:$4 sm:$0xff]  }
 0x21e   :  { %1207 = vst [vmem:[#allocation3 + $0x14] sm:$0xf] %v1203_v21  ;;  %1208 = vst [vmem:[#allocation3 + $0x1c] sm:$0xf] %v1204_v25  ;;  %1149 = vmatprep.mubr.bf16.mxu0 %v2216_v26  ;;  %2045 = vmatpush3.bf16.msra.mxu0 %v2526_v33 }
 0x21f   :  { %1150 = vmatmul.mubr.bf16.gmra.mxu0 %v1794_v27  ;;  %2046 = vmatprep.subr.bf16.mxu0 %v2528_v29  ;;  %1452 = vst [vmem:[#allocation3 + $0x18] sm:$0xf] %v1448_v39 }
 0x220   :  { %2021 = vmatpush3.bf16.msra.mxu1 %v2222_v28 }
 0x221   :  { %2022 = vmatprep.subr.bf16.mxu1 %v2224_v30 }
 0x222   :  { %2047 = vmatpush3.bf16.msra.mxu0 %v2227_v34 }
 0x223   :  { %v2232_v43 = vld [vmem:[#allocation3 + $0x4] ss:$8 sps:$4 sm:$0xff]   ;;  %2048 = vmatprep.subr.bf16.mxu0 %v2229_v22 }
 0x224   :  { %2023 = vmatpush3.bf16.msra.mxu1 %v2226_v35  ;;  %1645 = vmatprep.mubr.bf16.mxu0 %v2232_v43  ;;  %v1209_v42 = vld [vmem:[#allocation3] sm:$0xff]  ;;  %v1210_v49 = vld [vmem:[#allocation3 + $0x8] sm:$0xff] }
 0x225   :  { %v2240_v45 = vld [vmem:[#allocation3 + $0x14] ss:$8 sps:$4 sm:$0xff]   ;;  %2024 = vmatprep.subr.bf16.mxu1 %v2228_v36  ;;  %v1820_v51 = vcombine.low %v1209_v42, %v1210_v49 }
 0x226   :  { %1459 = vst [vmem:[#allocation3 + $0x14] sm:$0xf] %v1455_v38  ;;  %1460 = vst [vmem:[#allocation3 + $0x1c] sm:$0xf] %v1456_v40  ;;  %2049 = vmatpush3.bf16.msra.mxu0 %v2234_v0 }
 0x227   :  { %2050 = vmatprep.subr.bf16.mxu0 %v2236_v48 }
 0x228   :  { %2025 = vmatpush3.bf16.msra.mxu1 %v2233_v46 }
 0x229   :  { %2026 = vmatprep.subr.bf16.mxu1 %v2235_v44 }
 0x22a   :  { %2051 = vmatpush3.bf16.msra.mxu0 %v2238_v53 }
 0x22b   :  { %2052 = vmatprep.subr.bf16.mxu0 %v2239_v10 }
 0x22c   :  { %2027 = vmatpush3.bf16.msra.mxu1 %v2237_v2 }
 0x22d   :  { %2068 = vmatprep.subr.bf16.mxu1 %v2430_v7  ;;  %v1211_v55 = vld [vmem:[#allocation3 + $0x10] sm:$0xff]  ;;  %v1212_v57 = vld [vmem:[#allocation3 + $0x18] sm:$0xff] }
 0x22e   :  { %2053 = vmatpush3.bf16.msra.mxu0 %v2242_v50  ;;  %v1822_v59 = vcombine.low %v1211_v55, %v1212_v57  ;;  %v2247_v7 = vld [vmem:[#allocation3 + $0x14] ss:$8 sps:$4 sm:$0xff]  }
 0x22f   :  { %1394 = vmatmul.mubr.bf16.vlgmr.msra.gmra.mxu1 %v1820_v51  ;;  %2054 = vmatprep.subr.bf16.mxu0 %v2243_v52 }
 0x230   :  { %1401 = vmatprep.mubr.bf16.mxu1 %v2240_v45  ;;  %2076 = vmatpush3.bf16.msra.mxu1 %v2501_v47  ;;  %v2245_v47 = vld [vmem:[#allocation3 + $0x10] ss:$8 sps:$4 sm:$0xff]  }
 0x231   :  { %2069 = vmatprep.subr.bf16.mxu1 %v2505_v56 }
 0x232   :  { %2055 = vmatpush3.bf16.msra.mxu0 %v2244_v54 }
 0x234   :  { %2077 = vmatpush3.bf16.msra.mxu1 %v2510_v5 }
 0x235   :  { %2070 = vmatprep.subr.bf16.mxu1 %v2514_v13  ;;  %1646 = vmatmul.mubr.bf16.vlgmr.msra.gmra.mxu0 %v2230_v58 }
 0x237   :  { %1402 = vmatmul.mubr.bf16.gmra.mxu1 %v1822_v59 }
 0x238   :  { %2078 = vmatpush3.bf16.msra.mxu1 %v2526_v33  ;;  %1653 = vmatprep.mubr.bf16.mxu1 %v2247_v7 }
 0x239   :  { %2071 = vmatprep.subr.bf16.mxu1 %v2528_v29 }
 0x23c   :  { %2079 = vmatpush3.bf16.msra.mxu1 %v2227_v34 }
 0x23d   :  { %2072 = vmatprep.subr.bf16.mxu1 %v2229_v22 }
 0x240   :  { %2080 = vmatpush3.bf16.msra.mxu1 %v2234_v0 }
 0x241   :  { %2073 = vmatprep.subr.bf16.mxu1 %v2236_v48 }
 0x244   :  { %2081 = vmatpush3.bf16.msra.mxu1 %v2238_v53 }
 0x245   :  { %2074 = vmatprep.subr.bf16.mxu1 %v2239_v10 }
 0x248   :  { %2082 = vmatpush3.bf16.msra.mxu1 %v2242_v50 }
 0x249   :  { %2075 = vmatprep.subr.bf16.mxu1 %v2243_v52 }
 0x24c   :  { %2083 = vmatpush3.bf16.msra.mxu1 %v2244_v54 }
 0x24f   :  { %1654 = vmatmul.mubr.bf16.vlgmr.msra.gmra.mxu1 %v2245_v47 }
 0x2ce   :  { %v1972_v56 = vpop.f32.mrf.mxu1 }
 0x2d0   :  { %v1973_v60 = vpop.f32.mrf.mxu1 }
 0x2d1   :  { %v1974_v1 = vadd.f32 %v1973_v60, %v1972_v56 }
 0x2d2   :  { %v1975_v61 = vpop.f32.mrf.mxu1 }
 0x2d4   :  { %v1976_v62 = vpop.f32.mrf.mxu1 }
 0x2d5   :  { %v2000_v63 = vpop.f32.mrf.mxu0  ;;  %v1977_v3 = vadd.f32 %v1976_v62, %v1975_v61 }
 0x2d7   :  { %v2001_v4 = vpop.f32.mrf.mxu0  ;;  %v1915_v5 = vpack.c.bf16 %v1977_v3, %v1974_v1  ;;  %v1978_v8 = vpop.f32.mrf.mxu1 }
 0x2d8   :  { %v2002_v16 = vadd.f32 %v2001_v4, %v2000_v63 }
 0x2d9   :  { %v2003_v12 = vpop.f32.mrf.mxu0  ;;  %1916 = vst [vmem:[#allocation12] sm:$0xff] %v1915_v5   ;;  %v1979_v13 = vpop.f32.mrf.mxu1 }
 0x2da   :  { %v1980_v19 = vadd.f32 %v1979_v13, %v1978_v8 }
 0x2db   :  { %v2004_v15 = vpop.f32.mrf.mxu0  ;;  %v1981_v9 = vpop.f32.mrf.mxu1 }
 0x2dc   :  { %v2005_v17 = vadd.f32 %v2004_v15, %v2003_v12 }
 0x2dd   :  { %v1982_v14 = vpop.f32.mrf.mxu1 }
 0x2de   :  { %v1925_v11 = vpack.c.bf16 %v2005_v17, %v2002_v16  ;;  %v1983_v6 = vadd.f32 %v1982_v14, %v1981_v9 }
 0x2df   :  { %v2006_v20 = vpop.f32.mrf.mxu0 }
 0x2e0   :  { %1926 = vst [vmem:[#allocation12 + $0x10] sm:$0xff] %v1925_v11   ;;  %v1920_v21 = vpack.c.bf16 %v1983_v6, %v1980_v19 }
 0x2e1   :  { %v2007_v18 = vpop.f32.mrf.mxu0 }
 0x2e2   :  { %1952 = vst [vmem:[#allocation12 + $0x8] sm:$0xff] %v1920_v21   ;;  %v2008_v33 = vadd.f32 %v2007_v18, %v2006_v20 }
 0x2e3   :  { %v2009_v25 = vpop.f32.mrf.mxu0 }
 0x2e5   :  { %v2010_v23 = vpop.f32.mrf.mxu0 }
 0x2e6   :  { %v2011_v41 = vadd.f32 %v2010_v23, %v2009_v25 }
 0x2e8   :  { %v1930_v24 = vpack.c.bf16 %v2011_v41, %v2008_v33 }
 0x2ea   :  { %1953 = vst [vmem:[#allocation12 + $0x18] sm:$0xff] %v1930_v24  }
 0x2ef   :  { %v2028_v26 = vpop.f32.mrf.mxu1 }
 0x2f1   :  { %v2029_v27 = vpop.f32.mrf.mxu1 }
 0x2f2   :  { %v2030_v30 = vadd.f32 %v2029_v27, %v2028_v26 }
 0x2f3   :  { %v2031_v28 = vpop.f32.mrf.mxu1 }
 0x2f5   :  { %v2032_v29 = vpop.f32.mrf.mxu1  ;;  %v2056_v32 = vpop.f32.mrf.mxu0 }
 0x2f6   :  { %v2033_v31 = vadd.f32 %v2032_v29, %v2031_v28 }
 0x2f7   :  { %v2034_v34 = vpop.f32.mrf.mxu1  ;;  %v2057_v22 = vpop.f32.mrf.mxu0 }
 0x2f8   :  { %v1935_v35 = vpack.c.bf16 %v2033_v31, %v2030_v30  ;;  %v2058_v40 = vadd.f32 %v2057_v22, %v2056_v32 }
 0x2f9   :  { %v2035_v36 = vpop.f32.mrf.mxu1  ;;  %v2059_v37 = vpop.f32.mrf.mxu0 }
 0x2fa   :  { %1936 = vst [vmem:[#allocation12 + $0x20] sm:$0xff] %v1935_v35   ;;  %v2036_v45 = vadd.f32 %v2035_v36, %v2034_v34 }
 0x2fb   :  { %v2037_v38 = vpop.f32.mrf.mxu1  ;;  %v2060_v39 = vpop.f32.mrf.mxu0 }
 0x2fc   :  { %v2061_v0 = vadd.f32 %v2060_v39, %v2059_v37 }
 0x2fd   :  { %v2038_v43 = vpop.f32.mrf.mxu1 }
 0x2fe   :  { %v2039_v46 = vadd.f32 %v2038_v43, %v2037_v38  ;;  %v1945_v48 = vpack.c.bf16 %v2061_v0, %v2058_v40 }
 0x300   :  { %v1940_v44 = vpack.c.bf16 %v2039_v46, %v2036_v45  ;;  %1946 = vst [vmem:[#allocation12 + $0x30] sm:$0xff] %v1945_v48  }
 0x302   :  { %1954 = vst [vmem:[#allocation12 + $0x28] sm:$0xff] %v1940_v44  }
 0x30f   :  { %v2062_v53 = vpop.f32.mrf.mxu1 }
 0x311   :  { %v2063_v2 = vpop.f32.mrf.mxu1 }
 0x312   :  { %v2064_v49 = vadd.f32 %v2063_v2, %v2062_v53 }
 0x313   :  { %v2065_v10 = vpop.f32.mrf.mxu1 }
 0x315   :  { %v2066_v42 = vpop.f32.mrf.mxu1 }
 0x316   :  { %v2067_v50 = vadd.f32 %v2066_v42, %v2065_v10 }
 0x318   :  { %v1950_v51 = vpack.c.bf16 %v2067_v50, %v2064_v49 }
 0x31a   :  { %1955 = vst [vmem:[#allocation12 + $0x38] sm:$0xff] %v1950_v51  }
 0x31b   :  { %2347 = shalt.err (!%p2344_p10)
}
 0x31c   :  { %1694 = dma.vmem_to_hbm [thread:$0]  %s1689_s17, 1024, %s2554_s5, [#allocation6], %s2368_s28, %s2368_s28, %s2369_s29  }
 0x31d   :  { %2362 = dma.done.wait [#allocation6], 1024  }
 0x31e   :  { %2363 = vsyncadd [#allocation6], 4294966272 }
 0x31f   :  { %1698 = vsyncpa [#allocation5], 1 }
 0x320   :  { %1699 = vsyncpa [#allocation8], 1 }
 0x321   :  { %1700 = vsyncpa [#allocation11], 1 }
 0x322   :  { %1701 = vsyncpa [#allocation6], 1 }

</bundles_post_ra>
